<compile_context>
chip_gen: v5e
topology: v5e:2x2
jax: 0.10.0
libtpu: 0.0.40
codegen_flags: <defaults>
</compile_context>

<pallas_src>
import functools

import jax
import jax.numpy as jnp
from jax import lax
from jax.experimental import pallas as pl
from jax.experimental.pallas import tpu as pltpu


def _round_up(n, m):
    return (n + m - 1) // m * m


def _cdiv(a, b):
    return (a + b - 1) // b


def _choose_tiles(B, T, D, itemsize):
    """Pick (batch_tile, frame_tile) for the 2-D grid.

    Goals: frame tile multiple of 8 targeting >=256 contraction depth;
    BT*T_tile >= 256 rows for the assignment matmul; one x block <= ~8 MiB
    (v7x 64 MiB VMEM budget); >= 8 total grid steps when the problem allows
    so the software pipeline fills on both v7x TensorCores.
    """
    t_tile = min(_round_up(T, 8), 256)
    bt = max(1, 256 // t_tile)
    max_block_bytes = 8 << 20
    while bt > 1 and bt * t_tile * D * itemsize > max_block_bytes:
        bt //= 2
    bt = min(bt, max(1, B))

    def total_steps(bt_):
        return _cdiv(B, bt_) * _cdiv(T, t_tile)

    while bt > 1 and total_steps(bt) < 8:
        bt //= 2
    return bt, t_tile


def _netvlad_pp_kernel(x_ref, wt_ref, b_ref, c_ref, out_ref, acc_ref, s_ref,
                       *, t_total, mask_frames, mm_dtype, approx_recip):
    # x_ref:   (BT, Tt, D)  frame tile of the clip features (mm_dtype)
    # wt_ref:  (D, Kp)      conv1d weight, pre-transposed host-side (mm_dtype)
    # b_ref:   (1, Kp)      conv1d bias, f32 (-1e30 for padded clusters)
    # c_ref:   (Kp, D)      cluster centers, f32 (zero rows for padded clusters)
    # out_ref: (BT, Kp, D)  normalized VLAD block, f32
    # acc_ref: (BT, Kp, D)  f32 scratch:  sum_t a[b,t,k] * x[b,t,d]
    # s_ref:   (BT, Kp)     f32 scratch:  sum_t a[b,t,k]
    bt, tt, d = x_ref.shape
    kp = c_ref.shape[0]

    t_idx = pl.program_id(1)
    n_t = pl.num_programs(1)

    @pl.when(t_idx == 0)
    def _init():
        acc_ref[...] = jnp.zeros_like(acc_ref)
        s_ref[...] = jnp.zeros_like(s_ref)

    x = x_ref[...]                                   # (bt, tt, d)
    wt = wt_ref[...]                                 # (d, kp)
    b = b_ref[...]                                   # (1, kp) f32

    # --- soft-assignment: conv1d(kernel=1) == matmul over a (bt*tt, d) slab --
    x2 = x.reshape(bt * tt, d)
    logits = jnp.dot(x2, wt, preferred_element_type=jnp.float32) + b  # (bt*tt, kp)
    m = jnp.max(logits, axis=-1, keepdims=True)
    e = jnp.exp(logits - m)
    denom = jnp.sum(e, axis=-1, keepdims=True)
    a = e * pl.reciprocal(denom, approx=approx_recip)     # softmax, f32

    a3 = a.reshape(bt, tt, kp)
    if mask_frames:
        # Zero the assignment weights of zero-padded frames (ragged T).
        frame = t_idx * tt + lax.broadcasted_iota(jnp.int32, (1, tt, kp), 1)
        a3 = jnp.where(frame < t_total, a3, 0.0)

    # --- accumulate the decomposed VLAD over frame tiles ---------------------
    # vlad[b,k,d] = sum_t a[b,t,k]*x[b,t,d] - (sum_t a[b,t,k]) * c[k,d]
    s_ref[...] += jnp.sum(a3, axis=1)                     # (bt, kp)
    acc_ref[...] += lax.dot_general(
        a3.astype(mm_dtype), x,
        dimension_numbers=(((1,), (1,)), ((0,), (0,))),   # contract Tt, batch BT
        preferred_element_type=jnp.float32)               # (bt, kp, d)

    @pl.when(t_idx == n_t - 1)
    def _finalize():
        c = c_ref[...]                                    # (kp, d) f32
        vlad = acc_ref[...] - s_ref[...][:, :, None] * c[None, :, :]
        # intra-normalization: L2 per cluster row (F.normalize eps=1e-12)
        row_ss = jnp.sum(vlad * vlad, axis=-1, keepdims=True)
        vlad = vlad * lax.rsqrt(jnp.maximum(row_ss, 1e-24))
        # global L2 over the flattened (Kp*D) descriptor
        g_ss = jnp.sum(jnp.sum(vlad * vlad, axis=-1, keepdims=True),
                       axis=1, keepdims=True)
        out_ref[...] = (vlad * lax.rsqrt(jnp.maximum(g_ss, 1e-24))
                        ).astype(out_ref.dtype)


def netvlad_pp_forward(x, conv_w, conv_b, centers, *, block_b=None,
                       t_tile=None, matmul_dtype=jnp.bfloat16):
    """NetVLAD++ forward.

    x: (B, T, D); conv_w: (K, D); conv_b: (K,); centers: (K, D).
    Returns (B, K*D) float32, matching the PyTorch module.

    matmul_dtype: operand dtype for the two MXU matmuls (accumulation is
    always f32). bfloat16 (default) is MXU-native on v6e/v7x and halves the
    x HBM traffic; pass jnp.float32 for exact-mode verification.
    """
    B, T, D = x.shape
    K = centers.shape[0]
    mm_dtype = jnp.dtype(matmul_dtype)
    itemsize = mm_dtype.itemsize

    auto_bt, auto_tt = _choose_tiles(B, T, D, itemsize)
    bt = block_b if block_b is not None else auto_bt
    tt = t_tile if t_tile is not None else auto_tt
    bt = max(1, min(int(bt), B))
    tt = max(8, _round_up(min(int(tt), _round_up(T, 8)), 8))

    Kp = _round_up(K, 8)
    Bp = _round_up(B, bt)
    Tp = _round_up(T, tt)

    # NOTE: D is deliberately not padded (full-extent last block dim); only
    # the tiny K-sized operands are padded to the sublane multiple of 8.
    if (Bp, Tp) == (B, T):
        x_p = x.astype(mm_dtype)
    else:
        x_p = jnp.zeros((Bp, Tp, D), mm_dtype).at[:B, :T, :].set(
            x.astype(mm_dtype))
    w_t = jnp.zeros((D, Kp), mm_dtype).at[:, :K].set(conv_w.astype(mm_dtype).T)
    b_p = jnp.full((1, Kp), -1e30, jnp.float32).at[0, :K].set(
        conv_b.astype(jnp.float32))
    c_p = jnp.zeros((Kp, D), jnp.float32).at[:K, :].set(
        centers.astype(jnp.float32))

    grid = (Bp // bt, Tp // tt)

    kernel = functools.partial(
        _netvlad_pp_kernel,
        t_total=T,
        mask_frames=(Tp != T),
        mm_dtype=mm_dtype,
        approx_recip=(mm_dtype != jnp.dtype(jnp.float32)),
    )

    # VMEM budget: double-buffered x + output blocks, resident params and
    # scratch, plus headroom; clamp to [32 MiB default, 64 MiB v7x physical].
    x_block = bt * tt * D * itemsize
    out_block = bt * Kp * D * 4
    param_bytes = D * Kp * itemsize + Kp * 4 + Kp * D * 4
    scratch_bytes = bt * Kp * D * 4 + bt * Kp * 4
    need = 2 * x_block + 2 * out_block + 2 * param_bytes + scratch_bytes
    vmem_limit = int(min(64 << 20, max(32 << 20, need + (8 << 20))))

    flops = 4 * Bp * Tp * D * Kp                       # two matmuls
    transcendentals = Bp * Tp * Kp                     # softmax exp
    bytes_accessed = (x_p.size * itemsize + w_t.size * itemsize
                      + (b_p.size + c_p.size) * 4 + Bp * Kp * D * 4)

    out = pl.pallas_call(
        kernel,
        out_shape=jax.ShapeDtypeStruct((Bp, Kp, D), jnp.float32),
        grid=grid,
        in_specs=[
            pl.BlockSpec((bt, tt, D), lambda i, t: (i, t, 0)),   # x frame tile
            pl.BlockSpec((D, Kp), lambda i, t: (0, 0)),          # conv weight^T
            pl.BlockSpec((1, Kp), lambda i, t: (0, 0)),          # conv bias
            pl.BlockSpec((Kp, D), lambda i, t: (0, 0)),          # centers
        ],
        out_specs=pl.BlockSpec((bt, Kp, D), lambda i, t: (i, 0, 0)),
        scratch_shapes=[
            pltpu.VMEM((bt, Kp, D), jnp.float32),   # sum_t a*x accumulator
            pltpu.VMEM((bt, Kp), jnp.float32),      # sum_t a accumulator
        ],
        compiler_params=pltpu.CompilerParams(
            dimension_semantics=("parallel", "arbitrary"),
            vmem_limit_bytes=vmem_limit),
        cost_estimate=pl.CostEstimate(
            flops=int(flops),
            transcendentals=int(transcendentals),
            bytes_accessed=int(bytes_accessed)),
    )(x_p, w_t, b_p, c_p)

    # Strip K/B padding; cheap XLA slice/reshape outside the kernel.
    return out[:B, :K, :].reshape(B, K * D)


def _reference_forward(x, conv_w, conv_b, centers):
    # Pure-JAX replica of the PyTorch forward for verification.
    logits = jnp.einsum("btd,kd->bkt", x, conv_w) + conv_b[None, :, None]
    a = jax.nn.softmax(logits, axis=1)                              # (B, K, T)
    resid = x[:, None, :, :] - centers[None, :, None, :]            # (B, K, T, D)
    vlad = jnp.sum(resid * a[..., None], axis=2)                    # (B, K, D)
    vlad = vlad / jnp.maximum(
        jnp.linalg.norm(vlad, axis=-1, keepdims=True), 1e-12)
    vlad = vlad.reshape(x.shape[0], -1)
    vlad = vlad / jnp.maximum(
        jnp.linalg.norm(vlad, axis=-1, keepdims=True), 1e-12)
    return vlad


if __name__ == "__main__":
    # Small synthetic configuration: batch=8, clip_len(T)=16, feature_dim(D)=32,
    # num_clusters(K)=8.
    B, T, D, K = 8, 16, 32, 8

    key = jax.random.PRNGKey(0)
    k_x, k_c, k_w, k_b = jax.random.split(key, 4)

    x = jax.random.normal(k_x, (B, T, D), dtype=jnp.float32)
    centers = jax.random.uniform(k_c, (K, D), dtype=jnp.float32)
    bound = 1.0 / jnp.sqrt(jnp.float32(D))
    conv_w = jax.random.uniform(k_w, (K, D), dtype=jnp.float32,
                                minval=-bound, maxval=bound)
    conv_b = jax.random.uniform(k_b, (K,), dtype=jnp.float32,
                                minval=-bound, maxval=bound)

    ref = _reference_forward(x, conv_w, conv_b, centers)

    # 1) Exact-mode check (f32 matmuls) exercising the T-reduction grid axis
    #    (grid = (4 batch steps, 2 frame steps)).
    out_f32 = netvlad_pp_forward(x, conv_w, conv_b, centers,
                                 block_b=2, t_tile=8,
                                 matmul_dtype=jnp.float32)
    out_f32 = jax.block_until_ready(out_f32)
    assert out_f32.shape == (B, K * D)
    assert jnp.allclose(out_f32, ref, atol=1e-4, rtol=1e-4)

    # 2) Performance-default path: bf16 matmul operands / bf16 x in HBM /
    #    f32 accumulation, auto-chosen tiles.
    out_bf16 = netvlad_pp_forward(x, conv_w, conv_b, centers,
                                  matmul_dtype=jnp.bfloat16)
    out_bf16 = jax.block_until_ready(out_bf16)
    assert out_bf16.shape == (B, K * D)
    assert jnp.allclose(out_bf16, ref, atol=3e-2, rtol=3e-2)

    # 3) Ragged clip length (T=13 not a multiple of the frame tile) exercises
    #    the in-kernel frame mask.
    x_r = x[:, :13, :]
    ref_r = _reference_forward(x_r, conv_w, conv_b, centers)
    out_r = netvlad_pp_forward(x_r, conv_w, conv_b, centers,
                               block_b=2, t_tile=8,
                               matmul_dtype=jnp.float32)
    out_r = jax.block_until_ready(out_r)
    assert jnp.allclose(out_r, ref_r, atol=1e-4, rtol=1e-4)

    print("KERNEL_OK")
</pallas_src>

<mosaic_0001>
module attributes {stable_mosaic.version = 11 : i64} {
  func.func @_netvlad_pp_kernel(%arg0: i32, %arg1: i32, %arg2: memref<2x8x32xf32, #tpu.memory_space<vmem>>, %arg3: memref<32x8xf32, #tpu.memory_space<vmem>>, %arg4: memref<1x8xf32, #tpu.memory_space<vmem>>, %arg5: memref<8x32xf32, #tpu.memory_space<vmem>>, %arg6: memref<2x8x32xf32, #tpu.memory_space<vmem>>, %arg7: memref<2x8x32xf32, #tpu.memory_space<vmem>>, %arg8: memref<2x8xf32, #tpu.memory_space<vmem>>) attributes {dimension_semantics = [#tpu.dimension_semantics<parallel>, #tpu.dimension_semantics<arbitrary>], iteration_bounds = array<i64: 4, 2>, scalar_prefetch = 0 : i64, scratch_operands = 2 : i64, tpu.core_type = #tpu.core_type<tc>, window_params = [{transform_indices = @transform_0, window_bounds = array<i64: 2, 8, 32>}, {pipeline_mode = #tpu.pipeline_mode<synchronous>, transform_indices = @transform_1, window_bounds = array<i64: 32, 8>}, {pipeline_mode = #tpu.pipeline_mode<synchronous>, transform_indices = @transform_2, window_bounds = array<i64: 1, 8>}, {pipeline_mode = #tpu.pipeline_mode<synchronous>, transform_indices = @transform_3, window_bounds = array<i64: 8, 32>}, {transform_indices = @transform_4, window_bounds = array<i64: 2, 8, 32>}]} {
    %c0_i32 = arith.constant 0 : i32
    %0 = arith.cmpi eq, %arg1, %c0_i32 : i32
    %1 = arith.extui %0 : i1 to i32
    %c0_i32_0 = arith.constant 0 : i32
    %2 = arith.cmpi ne, %1, %c0_i32_0 : i32
    scf.if %2 {
      %cst_22 = arith.constant 0.000000e+00 : f32
      %32 = vector.broadcast %cst_22 : f32 to vector<2x8x32xf32>
      %c0_23 = arith.constant 0 : index
      %c0_24 = arith.constant 0 : index
      %c0_25 = arith.constant 0 : index
      %33 = vector.load %arg7[%c0_23, %c0_24, %c0_25] : memref<2x8x32xf32, #tpu.memory_space<vmem>>, vector<2x8x32xf32>
      tpu.vector_store %arg7[%c0_23, %c0_24, %c0_25], %32 {strides = array<i32>} : memref<2x8x32xf32, #tpu.memory_space<vmem>>, vector<2x8x32xf32>,
      %cst_26 = arith.constant 0.000000e+00 : f32
      %34 = vector.broadcast %cst_26 : f32 to vector<2x8xf32>
      %c0_27 = arith.constant 0 : index
      %c0_28 = arith.constant 0 : index
      %35 = vector.load %arg8[%c0_27, %c0_28] : memref<2x8xf32, #tpu.memory_space<vmem>>, vector<2x8xf32>
      tpu.vector_store %arg8[%c0_27, %c0_28], %34 {strides = array<i32>} : memref<2x8xf32, #tpu.memory_space<vmem>>, vector<2x8xf32>,
    } else {
    }
    %c0 = arith.constant 0 : index
    %c0_1 = arith.constant 0 : index
    %c0_2 = arith.constant 0 : index
    %3 = vector.load %arg2[%c0, %c0_1, %c0_2] : memref<2x8x32xf32, #tpu.memory_space<vmem>>, vector<2x8x32xf32>
    %c0_3 = arith.constant 0 : index
    %c0_4 = arith.constant 0 : index
    %4 = vector.load %arg3[%c0_3, %c0_4] : memref<32x8xf32, #tpu.memory_space<vmem>>, vector<32x8xf32>
    %c0_5 = arith.constant 0 : index
    %c0_6 = arith.constant 0 : index
    %5 = vector.load %arg4[%c0_5, %c0_6] : memref<1x8xf32, #tpu.memory_space<vmem>>, vector<1x8xf32>
    %6 = vector.shape_cast %3 : vector<2x8x32xf32> to vector<16x32xf32>
    %cst = arith.constant dense<0.000000e+00> : vector<16x8xf32>
    %7 = tpu.matmul %6, %4, %cst {dimension_numbers = #tpu.dot_dimension_numbers<[1], [0], [0], [1], [0, 0, 1, 1], [], []>} : vector<16x32xf32>, vector<32x8xf32>, vector<16x8xf32> -> vector<16x8xf32>
    %8 = vector.broadcast %5 : vector<1x8xf32> to vector<16x8xf32>
    %9 = arith.addf %7, %8 : vector<16x8xf32>
    %cst_7 = arith.constant dense<0xFF800000> : vector<16xf32>
    %10 = vector.multi_reduction <maximumf>, %9, %cst_7 [1] : vector<16x8xf32> to vector<16xf32>
    %11 = vector.shape_cast %10 : vector<16xf32> to vector<16x1xf32>
    %12 = vector.broadcast %11 : vector<16x1xf32> to vector<16x8xf32>
    %13 = arith.subf %9, %12 : vector<16x8xf32>
    %14 = math.exp %13 : vector<16x8xf32>
    %cst_8 = arith.constant dense<0.000000e+00> : vector<16xf32>
    %15 = vector.multi_reduction <add>, %14, %cst_8 [1] : vector<16x8xf32> to vector<16xf32>
    %16 = vector.shape_cast %15 : vector<16xf32> to vector<16x1xf32>
    %17 = tpu.reciprocal %16 : vector<16x1xf32> -> vector<16x1xf32>
    %18 = vector.broadcast %17 : vector<16x1xf32> to vector<16x8xf32>
    %19 = arith.mulf %14, %18 : vector<16x8xf32>
    %20 = vector.shape_cast %19 : vector<16x8xf32> to vector<2x8x8xf32>
    %c0_9 = arith.constant 0 : index
    %c0_10 = arith.constant 0 : index
    %21 = vector.load %arg8[%c0_9, %c0_10] : memref<2x8xf32, #tpu.memory_space<vmem>>, vector<2x8xf32>
    %cst_11 = arith.constant dense<0.000000e+00> : vector<2x8xf32>
    %22 = vector.multi_reduction <add>, %20, %cst_11 [1] : vector<2x8x8xf32> to vector<2x8xf32>
    %23 = arith.addf %21, %22 : vector<2x8xf32>
    %c0_12 = arith.constant 0 : index
    %c0_13 = arith.constant 0 : index
    %24 = vector.load %arg8[%c0_12, %c0_13] : memref<2x8xf32, #tpu.memory_space<vmem>>, vector<2x8xf32>
    tpu.vector_store %arg8[%c0_12, %c0_13], %23 {strides = array<i32>} : memref<2x8xf32, #tpu.memory_space<vmem>>, vector<2x8xf32>,
    %c0_14 = arith.constant 0 : index
    %c0_15 = arith.constant 0 : index
    %c0_16 = arith.constant 0 : index
    %25 = vector.load %arg7[%c0_14, %c0_15, %c0_16] : memref<2x8x32xf32, #tpu.memory_space<vmem>>, vector<2x8x32xf32>
    %cst_17 = arith.constant dense<0.000000e+00> : vector<2x8x32xf32>
    %26 = tpu.matmul %20, %3, %cst_17 {dimension_numbers = #tpu.dot_dimension_numbers<[1], [1], [2], [2], [0, 0, 0, 2, 1, 2], [0], [0]>} : vector<2x8x8xf32>, vector<2x8x32xf32>, vector<2x8x32xf32> -> vector<2x8x32xf32>
    %27 = arith.addf %25, %26 : vector<2x8x32xf32>
    %c0_18 = arith.constant 0 : index
    %c0_19 = arith.constant 0 : index
    %c0_20 = arith.constant 0 : index
    %28 = vector.load %arg7[%c0_18, %c0_19, %c0_20] : memref<2x8x32xf32, #tpu.memory_space<vmem>>, vector<2x8x32xf32>
    tpu.vector_store %arg7[%c0_18, %c0_19, %c0_20], %27 {strides = array<i32>} : memref<2x8x32xf32, #tpu.memory_space<vmem>>, vector<2x8x32xf32>,
    %c1_i32 = arith.constant 1 : i32
    %29 = arith.cmpi eq, %arg1, %c1_i32 : i32
    %30 = arith.extui %29 : i1 to i32
    %c0_i32_21 = arith.constant 0 : i32
    %31 = arith.cmpi ne, %30, %c0_i32_21 : i32
    scf.if %31 {
      %c0_22 = arith.constant 0 : index
      %c0_23 = arith.constant 0 : index
      %32 = vector.load %arg5[%c0_22, %c0_23] : memref<8x32xf32, #tpu.memory_space<vmem>>, vector<8x32xf32>
      %c0_24 = arith.constant 0 : index
      %c0_25 = arith.constant 0 : index
      %c0_26 = arith.constant 0 : index
      %33 = vector.load %arg7[%c0_24, %c0_25, %c0_26] : memref<2x8x32xf32, #tpu.memory_space<vmem>>, vector<2x8x32xf32>
      %c0_27 = arith.constant 0 : index
      %c0_28 = arith.constant 0 : index
      %34 = vector.load %arg8[%c0_27, %c0_28] : memref<2x8xf32, #tpu.memory_space<vmem>>, vector<2x8xf32>
      %35 = vector.shape_cast %34 : vector<2x8xf32> to vector<2x8x1xf32>
      %36 = vector.shape_cast %32 : vector<8x32xf32> to vector<1x8x32xf32>
      %37 = vector.broadcast %35 : vector<2x8x1xf32> to vector<2x8x32xf32>
      %38 = vector.broadcast %36 : vector<1x8x32xf32> to vector<2x8x32xf32>
      %39 = arith.mulf %37, %38 : vector<2x8x32xf32>
      %40 = arith.subf %33, %39 : vector<2x8x32xf32>
      %41 = arith.mulf %40, %40 : vector<2x8x32xf32>
      %cst_29 = arith.constant dense<0.000000e+00> : vector<2x8xf32>
      %42 = vector.multi_reduction <add>, %41, %cst_29 [2] : vector<2x8x32xf32> to vector<2x8xf32>
      %43 = vector.shape_cast %42 : vector<2x8xf32> to vector<2x8x1xf32>
      %cst_30 = arith.constant 1.000000e-24 : f32
      %44 = vector.broadcast %cst_30 : f32 to vector<2x8x1xf32>
      %45 = arith.maximumf %43, %44 : vector<2x8x1xf32>
      %46 = math.rsqrt %45 : vector<2x8x1xf32>
      %47 = vector.broadcast %46 : vector<2x8x1xf32> to vector<2x8x32xf32>
      %48 = arith.mulf %40, %47 : vector<2x8x32xf32>
      %49 = arith.mulf %48, %48 : vector<2x8x32xf32>
      %cst_31 = arith.constant dense<0.000000e+00> : vector<2x8xf32>
      %50 = vector.multi_reduction <add>, %49, %cst_31 [2] : vector<2x8x32xf32> to vector<2x8xf32>
      %51 = vector.shape_cast %50 : vector<2x8xf32> to vector<2x8x1xf32>
      %cst_32 = arith.constant dense<0.000000e+00> : vector<2x1xf32>
      %52 = vector.multi_reduction <add>, %51, %cst_32 [1] : vector<2x8x1xf32> to vector<2x1xf32>
      %53 = vector.shape_cast %52 : vector<2x1xf32> to vector<2x1x1xf32>
      %cst_33 = arith.constant 1.000000e-24 : f32
      %54 = vector.broadcast %cst_33 : f32 to vector<2x1x1xf32>
      %55 = arith.maximumf %53, %54 : vector<2x1x1xf32>
      %56 = math.rsqrt %55 : vector<2x1x1xf32>
      %57 = vector.broadcast %56 : vector<2x1x1xf32> to vector<2x8x32xf32>
      %58 = arith.mulf %48, %57 : vector<2x8x32xf32>
      %c0_34 = arith.constant 0 : index
      %c0_35 = arith.constant 0 : index
      %c0_36 = arith.constant 0 : index
      %59 = vector.load %arg6[%c0_34, %c0_35, %c0_36] : memref<2x8x32xf32, #tpu.memory_space<vmem>>, vector<2x8x32xf32>
      tpu.vector_store %arg6[%c0_34, %c0_35, %c0_36], %58 {strides = array<i32>} : memref<2x8x32xf32, #tpu.memory_space<vmem>>, vector<2x8x32xf32>,
    } else {
    }
    return
  }
  func.func @transform_0(%arg0: i32, %arg1: i32) -> (i32, i32, i32) {
    %c0_i32 = arith.constant 0 : i32
    %c0_i32_0 = arith.constant 0 : i32
    return %arg0, %arg1, %c0_i32 : i32, i32, i32
  }
  func.func @transform_1(%arg0: i32, %arg1: i32) -> (i32, i32) {
    %c0_i32 = arith.constant 0 : i32
    %c0_i32_0 = arith.constant 0 : i32
    %c0_i32_1 = arith.constant 0 : i32
    return %c0_i32, %c0_i32_0 : i32, i32
  }
  func.func @transform_2(%arg0: i32, %arg1: i32) -> (i32, i32) {
    %c0_i32 = arith.constant 0 : i32
    %c0_i32_0 = arith.constant 0 : i32
    %c0_i32_1 = arith.constant 0 : i32
    return %c0_i32, %c0_i32_0 : i32, i32
  }
  func.func @transform_3(%arg0: i32, %arg1: i32) -> (i32, i32) {
    %c0_i32 = arith.constant 0 : i32
    %c0_i32_0 = arith.constant 0 : i32
    %c0_i32_1 = arith.constant 0 : i32
    return %c0_i32, %c0_i32_0 : i32, i32
  }
  func.func @transform_4(%arg0: i32, %arg1: i32) -> (i32, i32, i32) {
    %c0_i32 = arith.constant 0 : i32
    %c0_i32_0 = arith.constant 0 : i32
    %c0_i32_1 = arith.constant 0 : i32
    return %arg0, %c0_i32, %c0_i32_0 : i32, i32, i32
  }
}

</mosaic_0001>

<bundles_post_ra>
// kernel: tpu_custom_call.1
= control target key start
LH: loop header
LB: loop body
LE: loop exit
PB: predicated region body
PF: predicated region fallthrough
CT: control target
= control target key end

     0   :  { %9 = vsyncpa [#allocation5], 0  ;;  %s1232_s0 = inlined_call_operand.hbm [shape: f32[8,16,32], index: 0, kind: input, shape index: {}]   ;;  %s1233_s1 = inlined_call_operand.vmem [shape: f32[32,8], index: 1, kind: input, shape index: {}]   ;;  %s1234_s2 = inlined_call_operand.vmem [shape: f32[1,8], index: 2, kind: input, shape index: {}]   ;;  %s1235_s3 = inlined_call_operand.vmem [shape: f32[8,32], index: 3, kind: input, shape index: {}]   ;;  %s1236_s4 = inlined_call_operand.hbm [shape: f32[8,8,32], index: 4, kind: output, shape index: {}]  }
   0x1   :  { %11 = vsyncpa [#allocation5 + $0x1], 0 }
   0x2   :  { %12 = vsyncpa [#allocation6], 0 }
   0x3   :  { %14 = vsyncpa [#allocation6 + $0x1], 0  ;;  %s1019_s15 = smov 0   ;;  %s1021_s16 = smov 0  }
   0x4   :  { %s1023_s17 = smov 0   ;;  %s1025_s18 = smov 0  }
   0x5   :  { %s1027_s19 = smov 0   ;;  %s1029_s20 = smov 0  }
   0x6   :  { %s1031_s21 = smov 0   ;;  %s1033_s22 = smov 0  }
   0x7   :  { %s1035_s23 = smov 0   ;;  %s1037_s24 = smov 0  }
   0x8   :  { %s1039_s25 = smov 0  }
   0x9 LB: > { %1242 = sst [smem:[#allocation10_spill]] %s954_s17  ;;  %s679_s26 = sadd.s32 4294967295, %s986_s25   ;;  %s986_s25 = sphi %s1039_s25, %s20_s25   ;;  %s982_s24 = sphi %s1037_s24, %s1267_s24   ;;  %s978_s23 = sphi %s1035_s23, %s1266_s23   ;;  %s974_s22 = sphi %s1033_s22, %s1265_s22   ;;  %s970_s21 = sphi %s1031_s21, %s1264_s21   ;;  %s966_s20 = sphi %s1029_s20, %s1257_s20   ;;  %s962_s19 = sphi %s1027_s19, %s1263_s19   ;;  %s958_s18 = sphi %s1025_s18, %s1262_s18   ;;  %s954_s17 = sphi %s1023_s17, %s1255_s17   ;;  %s950_s16 = sphi %s1021_s16, %s1261_s16   ;;  %s946_s15 = sphi %s1019_s15, %s1260_s15  }
   0xa   : > { %1243 = sst [smem:[#allocation11_spill]] %s966_s20  ;;  %s680_s27 = sadd.s32 4294967294, %s986_s25  }
   0xb   : > { %s29_s28 = sadd.s32 1, %s978_s23  ;;  %s32_s29 = sadd.s32 1, %s982_s24 }
   0xc   : > { %p30_p0 = scmp.ge.s32.totalorder %s29_s28, 2  ;;  %s41_s30 = sadd.s32 1, %s966_s20 }
   0xd   : > { %p48_p1 = scmp.ne.s32.totalorder %s966_s20, %s962_s19  ;;  %p49_p2 = scmp.eq.s32.totalorder %s986_s25, 0 }
   0xe   : > { %s1269_s28 = smov (%p30_p0, %s29_s28), 0  ;;  %s1271_s29 = smov (!%p30_p0, %s32_s29), %s982_s24 }
   0xf   : > { %1244 = sst [smem:[#allocation12_spill]] %s1269_s28  ;;  %s37_s5 = ssub.s32 %s978_s23, %s1269_s28 }
  0x10   : > { %p1085_p3 = por %p49_p2, %p48_p1  ;;  %p34_p4 = scmp.ge.s32.totalorder %s1271_s29, 4 }
  0x11   : > { %p54_p5 = scmp.ne.s32.totalorder %s962_s19, %s958_s18  ;;  %p55_p6 = scmp.eq.s32.totalorder %s679_s26, 0 }
  0x12   : > { %s130_s7 = sadd.s32 1, %s954_s17  ;;  %s1273_s29 = smov (%p34_p4, %s1271_s29), 0 }
  0x13   : > { %1246 = sst [smem:[#allocation13_spill]] %s1273_s29  ;;  %p1093_p7 = por %p55_p6, %p54_p5 }
  0x14   : > { %p140_p8 = scmp.ne.s32.totalorder %s954_s17, %s950_s16  ;;  %s36_s9 = ssub.s32 %s982_s24, %s1273_s29 }
  0x15   : > { %p141_p9 = scmp.eq.s32.totalorder %s679_s26, 7  ;;  %s38_s10 = sor.u32 %s37_s5, %s36_s9 }
  0x16   : > { %p128_p10 = scmp.eq.s32.totalorder %s36_s9, 0  ;;  %p39_p11 = scmp.eq.s32.totalorder %s38_s10, 0 }
  0x17   : > { %p1101_p12 = por %p141_p9, %p140_p8  ;;  %p146_p13 = scmp.ne.s32.totalorder %s950_s16, %s946_s15 }
  0x18   : > { %s1106_s12 = scalar_select %p128_p10, %s954_s17, %s130_s7  }
  0x19   : > { %s1109_s13 = scalar_select %p39_p11, %s966_s20, %s41_s30  }
  0x1a   : > { %1249 = sst [smem:[#allocation14_spill]] %s1106_s12  ;;  %p147_p0 = scmp.eq.s32.totalorder %s680_s27, 7 }
  0x1b   : > { %1250 = sst [smem:[#allocation15_spill]] %s1109_s13  ;;  %p719_p1 = scmp.lt.s32.totalorder %s986_s25, 8 }
  0x1c   : > { %p1114_p2 = por %p147_p0, %p146_p13  ;;  %s176_s18 = sand.u32 1, %s966_s20  }
  0x1d   : > { %s683_s26 = sshll.u32 %s176_s18, 4  ;;  %s701_s5 = sshll.u32 %s982_s24, 2 }
  0x1e   : > { %s1251_s14 = scalar_select %p1114_p2, 1, 0 }
  0x1f   : > { %s185_s9 = sadd.s32 %s978_s23, %s701_s5  ;;  %s180_s10 = scalar_lea.vmem [#allocation4], %s683_s26 }
  0x20   : > { %1252 = sst [smem:[#allocation16_spill]] %s1251_s14  ;;  %s190_s29 = sshll.u32 %s180_s10, 4  ;;  %s191_s29 = int_to_ptr.vmem [resolvable:$true] %s190_s29 }
  0x21   : > { %s686_s28 = sshll.u32 %s185_s9, 3  ;;  %p712_p4 = pnand %p719_p1, %p1085_p3 }
  0x22   : > { %s187_s13 = scalar_lea.hbm %s1232_s0, %s686_s28  ;;  %s177_s12 = scalar_lea.sflag [#allocation5], %s176_s18 }
  0x23   : > { %s188_s27 = sshll.u32 %s187_s13, 4  ;;  %s988_s17 = smov 256   ;;  %s189_s27 = int_to_ptr.hbm [resolvable:$true] %s188_s27 }
  0x24   : > { %s989_s20 = smov 128   ;;  %s990_s14 = smov 8  }
  0x25   : > { %714 = dma.hbm_to_vmem [thread:$0]  (!%p712_p4), %s189_s27, 256, %s191_s29, %s177_s12, %s988_s17, %s989_s20, %s990_s14  }
  0x26   : > { %p687_p5 = scmp.ge.s32.totalorder %s986_s25, 1  ;;  %p198_p6 = scmp.lt.s32.totalorder %s986_s25, 9 }
  0x28   : > { %p199_p8 = pnand %p687_p5, %p198_p6 }
  0x29   : > { %s204_s26 = sand.u32 (!%p199_p8), 1, %s962_s19  }
  0x2a   : > { %202 = sbr.rel (%p199_p8) target bundleno = 1206 (0x4b6), region = 36  ;;  %s688_s5 = sshll.u32 (!%p199_p8), %s204_s26, 4 }
  0x2b   : > { %s205_s9 = scalar_lea.sflag (!%p199_p8), [#allocation5], %s204_s26  ;;  %s208_s10 = scalar_lea.vmem (!%p199_p8), [#allocation4], %s688_s5 }
  0x2f   : > { %937 = dma.done.wait (%p1093_p7), %s205_s9, 256  }
  0x30   : > { %939 = vsyncadd (%p1093_p7), %s205_s9, 4294967040  ;;  %s231_s28 = sand.u32 1, %s950_s16   ;;  %p690_p3 = scmp.ne.s32.totalorder %s970_s21, 0 }
  0x31   : > { %s689_s17 = sshll.u32 %s231_s28, 4 }
  0x32   : > { %s1136_s20 = scalar_lea.vmem [#allocation7], %s689_s17  ;;  %239 = sbr.rel (%p690_p3) target bundleno = 59 (0x3b), region = 44 }
  0x37   : > { %vm240_vm0 = vcmask 261120   ;;  %vm243_vm1 = vcmask 58368   ;;  %v991_v0 = vmov 0.0  }
  0x38   : > { %241 = vst.msk [vmem:[#allocation2] sm:$0xff] %vm240_vm0, %v991_v0 }
  0x39   : > { %242 = vst.msk [vmem:[#allocation2 + $0x8] sm:$0xff] %vm240_vm0, %v991_v0 }
  0x3a   : > { %244 = vst.msk [vmem:[#allocation3] sm:$0x3] %vm243_vm1, %v991_v0 }
  0x3b PF: > { %v250_v1 = vld [vmem:[%s1233_s1 + $0x18] sm:$0xff]  ;;  %v249_v2 = vld [vmem:[%s1233_s1 + $0x10] sm:$0xff]  ;;  %v248_v5 = vld [vmem:[%s1233_s1 + $0x8] sm:$0xff]  ;;  %vm255_vm2 = vcmask 261120   ;;  %vm285_vm3 = vcmask 64512   ;;  %vm351_vm12 = vcmask 1041409  }
  0x3c   : > { %703 = vmatpush.msra.mxu3 %v250_v1  ;;  %v246_v3 = vld [vmem:[%s208_s10 + $0x8] sm:$0xff]  ;;  %274 = vmatpush.msra.mxu0 %v250_v1  ;;  %v245_v4 = vld [vmem:[%s208_s10] sm:$0xff]  ;;  %vm355_vm13 = vcmask 58368   ;;  %p695_p7 = scmp.ne.s32.totalorder %s970_s21, 1 }
  0x3d   : > { %464 = vmatpush.msra.mxu2 %v246_v3  ;;  %409 = vmatpush.msra.mxu1 %v245_v4  ;;  %v247_v6 = vld [vmem:[%s1233_s1] sm:$0xff] }
  0x3e   : > { %704 = vmatpush.msra.mxu3 %v249_v2  ;;  %275 = vmatpush.msra.mxu0 %v249_v2  ;;  %v816_v7 = vld [vmem:[%s1234_s2] ss:$0 sm:$0xff] }
  0x40   : > { %705 = vmatpush.msra.mxu3 %v248_v5  ;;  %276 = vmatpush.msra.mxu0 %v248_v5  ;;  %v357_v5 = vld [vmem:[#allocation2] sm:$0xff] }
  0x41   : > { %v334_v61 = vld [vmem:[#allocation3] sm:$0x3] }
  0x42   : > { %706 = vmatpush.msra.mxu3 %v247_v6  ;;  %277 = vmatpush.msra.mxu0 %v247_v6 }
  0x43   : > { %692 = vmatmul.msk.f32.vlgmr.msra.gmra.mxu3 %vm255_vm2, %v246_v3  ;;  %691 = vmatmul.msk.f32.vlgmr.msra.gmra.mxu0 %vm255_vm2, %v245_v4  ;;  %v358_v3 = vld [vmem:[#allocation2 + $0x8] sm:$0xff] }
  0xc0   : > { %v279_v10 = vpop.f32.mrf.mxu0 }
  0xc1   : > { %v280_v12 = vadd.f32 %v816_v7, %v279_v10 }
  0xc3   : > { %v286_v13 = vsel %vm285_vm3, %v280_v12, -inf }
  0xc6   : > { %v282_v8 = vpop.f32.mrf.mxu3 }
  0xc7   : > { %v283_v9 = vadd.f32 %v816_v7, %v282_v8 }
  0xc9   : > { %v289_v11 = vsel %vm285_vm3, %v283_v9, -inf }
  0xca   : > { %290 = vmax.xlane.f32.xlu0 %v289_v11 }
  0xd2   : > { %287 = vmax.xlane.f32.xlu0 %v286_v13 }
 0x13d   : > { %v291_v14 = vpop.xlane.xlu0 %290 }
 0x13e   : > { %v293_v15 = vsub.f32 %v283_v9, %v291_v14 }
 0x140   : > { %v296_v16 = vmul.f32 1.442695, %v293_v15 }
 0x142   : > { %817 = vpow2.f32 %v296_v16 }
 0x145   : > { %v288_v17 = vpop.xlane.xlu0 %287 }
 0x146   : > { %v292_v18 = vsub.f32 %v280_v12, %v288_v17 }
 0x148   : > { %v818_v19 = vpop.eup %817  ;;  %v294_v20 = vmul.f32 1.442695, %v292_v18 }
 0x149   : > { %v301_v21 = vsel %vm285_vm3, %v818_v19, 0.0 }
 0x14a   : > { %819 = vpow2.f32 %v294_v20  ;;  %302 = vadd.xlane.f32.xlu1 %v301_v21 }
 0x150   : > { %v820_v22 = vpop.eup %819 }
 0x151   : > { %v298_v23 = vsel %vm285_vm3, %v820_v22, 0.0 }
 0x152   : > { %299 = vadd.xlane.f32.xlu1 %v298_v23 }
 0x1bd   : > { %v303_v24 = vpop.xlane.xlu1 %302 }
 0x1be   : > { %821 = vrcp.f32 %v303_v24  ;;  %v329_v29 = vand.u32 2147483648, %v303_v24  ;;  %v327_v31 = vand.u32 2147483647, %v303_v24  ;;  %vm323_vm5 = vweird.f32 %v303_v24 }
 0x1c0   : > { %v330_v34 = vor.u32 1.1754944e-38, %v329_v29  ;;  %vm328_vm7 = vcmp.eq.f32.partialorder %v327_v31, 8.507059e+37 }
 0x1c4   : > { %v822_v25 = vpop.eup %821 }
 0x1c5   : > { %v319_v26 = vmul.f32 %v822_v25, %v303_v24  ;;  %v300_v27 = vpop.xlane.xlu1 %299  ;;  %vm324_vm4 = vweird.f32 %v822_v25 }
 0x1c6   : > { %823 = vrcp.f32 %v300_v27  ;;  %vm325_vm6 = vmor %vm323_vm5, %vm324_vm4  ;;  %v315_v40 = vand.u32 2147483648, %v300_v27  ;;  %v313_v43 = vand.u32 2147483647, %v300_v27  ;;  %vm309_vm9 = vweird.f32 %v300_v27 }
 0x1c7   : > { %v320_v28 = vsub.f32 1.0, %v319_v26 }
 0x1c8   : > { %v316_v46 = vor.u32 1.1754944e-38, %v315_v40  ;;  %vm314_vm11 = vcmp.eq.f32.partialorder %v313_v43, 8.507059e+37 }
 0x1c9   : > { %v321_v30 = vmul.f32 %v822_v25, %v320_v28 }
 0x1cb   : > { %v322_v32 = vadd.f32 %v822_v25, %v321_v30 }
 0x1cc   : > { %v824_v33 = vpop.eup %823 }
 0x1cd   : > { %v305_v35 = vmul.f32 %v824_v33, %v300_v27  ;;  %v326_v36 = vsel %vm325_vm6, %v822_v25, %v322_v32  ;;  %vm310_vm8 = vweird.f32 %v824_v33 }
 0x1ce   : > { %v331_v37 = vsel %vm328_vm7, %v330_v34, %v326_v36  ;;  %vm311_vm10 = vmor %vm309_vm9, %vm310_vm8 }
 0x1cf   : > { %v306_v38 = vsub.f32 1.0, %v305_v35  ;;  %v333_v39 = vmul.f32 %v818_v19, %v331_v37 }
 0x1d1   : > { %v307_v41 = vmul.f32 %v824_v33, %v306_v38  ;;  %414 = vxpose.xlu2.b32.start.end [1/1] (short) (narrow) %v333_v39, 8  ;;  %v342_v42 = vsel %vm285_vm3, %v333_v39, 0.0 }
 0x1d2   : > { %v343_v44 = vrot.slane %v342_v42, 4 }
 0x1d3   : > { %v308_v45 = vadd.f32 %v824_v33, %v307_v41 }
 0x1d4   : > { %v344_v47 = vadd.f32 %v343_v44, %v342_v42 }
 0x1d5   : > { %v312_v48 = vsel %vm311_vm10, %v824_v33, %v308_v45 }
 0x1d6   : > { %v317_v49 = vsel %vm314_vm11, %v316_v46, %v312_v48  ;;  %v345_v51 = vrot.slane %v344_v47, 2 }
 0x1d7   : > { %v332_v50 = vmul.f32 %v820_v22, %v317_v49 }
 0x1d8   : > { %v346_v54 = vadd.f32 %v345_v51, %v344_v47 }
 0x1d9   : > { %359 = vxpose.xlu2.b32.start.end [1/1] (short) (narrow) %v332_v50, 8  ;;  %v335_v52 = vsel %vm285_vm3, %v332_v50, 0.0 }
 0x1da   : > { %v336_v53 = vrot.slane %v335_v52, 4  ;;  %v347_v57 = vrot.slane %v346_v54, 1 }
 0x1dc   : > { %v337_v55 = vadd.f32 %v336_v53, %v335_v52  ;;  %v348_v60 = vadd.f32 %v347_v57, %v346_v54 }
 0x1de   : > { %v338_v56 = vrot.slane %v337_v55, 2 }
 0x1e0   : > { %v339_v58 = vadd.f32 %v338_v56, %v337_v55 }
 0x1e2   : > { %v340_v59 = vrot.slane %v339_v58, 1 }
 0x1e4   : > { %v341_v62 = vadd.f32 %v340_v59, %v339_v58 }
 0x1e6   : > { %v352_v63 = vsel %vm351_vm12, %v348_v60, %v341_v62 }
 0x1e7   : > { %v354_v0 = vadd.f32 %v352_v63, %v334_v61 }
 0x1e9   : > { %356 = vst.msk [vmem:[#allocation3] sm:$0x3] %vm355_vm13, %v354_v0 }
 0x26a   : > { %v430_v1 = vpop.trf.xlu2 }
 0x26b   : > { %694 = vmatmul.msk.f32.vlgmr.msra.gmra.mxu2 %vm285_vm3, %v430_v1 }
 0x272   : > { %v375_v2 = vpop.trf.xlu2 }
 0x273   : > { %693 = vmatmul.msk.f32.vlgmr.msra.gmra.mxu1 %vm285_vm3, %v375_v2 }
 0x2ee   : > { %v466_v4 = vpop.f32.mrf.mxu2 }
 0x2ef   : > { %v470_v6 = vadd.f32 %v466_v4, %v358_v3  ;;  %476 = sbr.rel (%p695_p7) target bundleno = 1190 (0x4a6), region = 48 }
 0x2f0   : > { %v411_v7 = vpop.f32.mrf.mxu1 }
 0x2f1   : > { %472 = vst.msk [vmem:[#allocation2 + $0x8] sm:$0xff] %vm255_vm2, %v470_v6  ;;  %v469_v8 = vadd.f32 %v411_v7, %v357_v5 }
 0x2f3   : > { %471 = vst.msk [vmem:[#allocation2] sm:$0xff] %vm255_vm2, %v469_v8 }
 0x2f4   : > { %v482_v9 = vlaneseq  ;;  %v480_v11 = vld [vmem:[#allocation3] sm:$0x3]  ;;  %v477_v14 = vld [vmem:[%s1235_s3] sm:$0xff] }
 0x2f5   : > { %v481_v12 = vperm.slane %v480_v11, 0  ;;  %v488_v13 = vperm.slane %v480_v11, 1 }
 0x2f6   : > { %v483_v10 = vshrl.u32 %v482_v9, 7 }
 0x2f8   : > { %825 = vset.pattern.permute.xlu0 %v483_v10  ;;  %v479_v22 = vld [vmem:[#allocation2 + $0x8] sm:$0xff] }
 0x2fa   : > { %v478_v16 = vld [vmem:[#allocation2] sm:$0xff] }
 0x300   : > { %486 = vperm.xlu0 %825, %v481_v12  }
 0x308   : > { %493 = vperm.xlu0 %825, %v488_v13  }
 0x372   : > { %v487_v15 = vpop.permute.xlu0 %486 }
 0x373   : > { %v495_v17 = vmul.f32 %v487_v15, %v477_v14 }
 0x375   : > { %v497_v18 = vsub.f32 %v478_v16, %v495_v17 }
 0x377   : > { %v499_v19 = vmul.f32 %v497_v18, %v497_v18 }
 0x379   : > { %v501_v20 = vsel %vm255_vm2, %v499_v19, 0.0 }
 0x37a   : > { %v494_v21 = vpop.permute.xlu0 %493  ;;  %502 = vadd.xlane.f32.xlu1 %v501_v20 }
 0x37b   : > { %v496_v23 = vmul.f32 %v494_v21, %v477_v14 }
 0x37d   : > { %v498_v24 = vsub.f32 %v479_v22, %v496_v23 }
 0x37f   : > { %v500_v25 = vmul.f32 %v498_v24, %v498_v24 }
 0x381   : > { %v504_v26 = vsel %vm255_vm2, %v500_v25, 0.0 }
 0x382   : > { %505 = vadd.xlane.f32.xlu1 %v504_v26 }
 0x3ed   : > { %v503_v27 = vpop.xlane.xlu1 %502 }
 0x3ee   : > { %v507_v28 = vmax.f32 %v503_v27, 1e-24 }
 0x3f0   : > { %826 = vrsqrt.f32 %v507_v28  ;;  %vm515_vm15 = vweird.f32 %v507_v28 }
 0x3f5   : > { %v506_v29 = vpop.xlane.xlu1 %505 }
 0x3f6   : > { %v827_v30 = vpop.eup %826  ;;  %v508_v31 = vmax.f32 %v506_v29, 1e-24 }
 0x3f7   : > { %v510_v32 = vmul.f32 %v827_v30, %v507_v28  ;;  %vm516_vm14 = vweird.f32 %v827_v30 }
 0x3f8   : > { %828 = vrsqrt.f32 %v508_v31  ;;  %vm517_vm0 = vmor %vm515_vm15, %vm516_vm14  ;;  %vm525_vm3 = vweird.f32 %v508_v31 }
 0x3f9   : > { %v511_v33 = vmul.f32 %v827_v30, %v510_v32 }
 0x3fb   : > { %v512_v34 = vmul.f32 0.5, %v511_v33 }
 0x3fd   : > { %v513_v35 = vsub.f32 1.5, %v512_v34 }
 0x3fe   : > { %v829_v36 = vpop.eup %828 }
 0x3ff   : > { %v520_v37 = vmul.f32 %v829_v36, %v508_v31  ;;  %v514_v38 = vmul.f32 %v827_v30, %v513_v35  ;;  %vm526_vm1 = vweird.f32 %v829_v36 }
 0x400   : > { %vm527_vm4 = vmor %vm525_vm3, %vm526_vm1 }
 0x401   : > { %v521_v39 = vmul.f32 %v829_v36, %v520_v37  ;;  %v518_v40 = vsel %vm517_vm0, %v827_v30, %v514_v38 }
 0x402   : > { %v529_v41 = vmul.f32 %v518_v40, %v497_v18 }
 0x403   : > { %v522_v42 = vmul.f32 0.5, %v521_v39 }
 0x404   : > { %v531_v43 = vmul.f32 %v529_v41, %v529_v41 }
 0x405   : > { %v523_v44 = vsub.f32 1.5, %v522_v42 }
 0x406   : > { %v533_v45 = vsel %vm255_vm2, %v531_v43, 0.0 }
 0x407   : > { %534 = vadd.xlane.f32.xlu2 %v533_v45  ;;  %v524_v46 = vmul.f32 %v829_v36, %v523_v44 }
 0x409   : > { %v528_v47 = vsel %vm527_vm4, %v829_v36, %v524_v46 }
 0x40a   : > { %v530_v48 = vmul.f32 %v528_v47, %v498_v24 }
 0x40c   : > { %v532_v49 = vmul.f32 %v530_v48, %v530_v48 }
 0x40e   : > { %v536_v50 = vsel %vm255_vm2, %v532_v49, 0.0 }
 0x40f   : > { %537 = vadd.xlane.f32.xlu2 %v536_v50 }
 0x47a   : > { %v535_v51 = vpop.xlane.xlu2 %534 }
 0x47b   : > { %v539_v52 = vrot.slane %v535_v51, 4 }
 0x47d   : > { %v540_v53 = vadd.f32 %v539_v52, %v535_v51 }
 0x47f   : > { %v541_v54 = vrot.slane %v540_v53, 2 }
 0x481   : > { %v542_v55 = vadd.f32 %v541_v54, %v540_v53 }
 0x482   : > { %v538_v56 = vpop.xlane.xlu2 %537 }
 0x483   : > { %v543_v57 = vrot.slane %v542_v55, 1  ;;  %v545_v58 = vrot.slane %v538_v56, 4 }
 0x485   : > { %v544_v59 = vadd.f32 %v543_v57, %v542_v55  ;;  %v546_v60 = vadd.f32 %v545_v58, %v538_v56 }
 0x487   : > { %v551_v61 = vmax.f32 %v544_v59, 1e-24  ;;  %v547_v62 = vrot.slane %v546_v60, 2 }
 0x489   : > { %830 = vrsqrt.f32 %v551_v61  ;;  %v548_v63 = vadd.f32 %v547_v62, %v546_v60  ;;  %vm559_vm6 = vweird.f32 %v551_v61 }
 0x48b   : > { %v549_v0 = vrot.slane %v548_v63, 1 }
 0x48d   : > { %v550_v1 = vadd.f32 %v549_v0, %v548_v63 }
 0x48f   : > { %v831_v2 = vpop.eup %830  ;;  %v552_v3 = vmax.f32 %v550_v1, 1e-24 }
 0x490   : > { %v554_v4 = vmul.f32 %v831_v2, %v551_v61  ;;  %vm560_vm5 = vweird.f32 %v831_v2 }
 0x491   : > { %832 = vrsqrt.f32 %v552_v3  ;;  %vm561_vm7 = vmor %vm559_vm6, %vm560_vm5  ;;  %vm569_vm9 = vweird.f32 %v552_v3 }
 0x492   : > { %v555_v5 = vmul.f32 %v831_v2, %v554_v4 }
 0x494   : > { %v556_v6 = vmul.f32 0.5, %v555_v5 }
 0x496   : > { %v557_v7 = vsub.f32 1.5, %v556_v6 }
 0x497   : > { %v833_v8 = vpop.eup %832 }
 0x498   : > { %v558_v9 = vmul.f32 %v831_v2, %v557_v7  ;;  %v564_v10 = vmul.f32 %v833_v8, %v552_v3  ;;  %vm570_vm8 = vweird.f32 %v833_v8 }
 0x499   : > { %vm571_vm10 = vmor %vm569_vm9, %vm570_vm8 }
 0x49a   : > { %v562_v11 = vsel %vm561_vm7, %v831_v2, %v558_v9  ;;  %v565_v12 = vmul.f32 %v833_v8, %v564_v10 }
 0x49b   : > { %v573_v13 = vmul.f32 %v562_v11, %v529_v41 }
 0x49c   : > { %v566_v14 = vmul.f32 0.5, %v565_v12 }
 0x49d   : > { %575 = vst.msk [vmem:[%s1136_s20] sm:$0xff] %vm255_vm2, %v573_v13 }
 0x49e   : > { %v567_v15 = vsub.f32 1.5, %v566_v14 }
 0x4a0   : > { %v568_v16 = vmul.f32 %v833_v8, %v567_v15 }
 0x4a2   : > { %v572_v17 = vsel %vm571_vm10, %v833_v8, %v568_v16 }
 0x4a3   : > { %v574_v18 = vmul.f32 %v572_v17, %v530_v48 }
 0x4a5   : > { %576 = vst.msk [vmem:[%s1136_s20 + $0x8] sm:$0xff] %vm255_vm2, %v574_v18 }
 0x4a6 PF: > { %s702_s21 = sshll.u32 %s974_s22, 4  ;;  %s590_s29 = sshll.u32 %s1136_s20, 4  ;;  %s591_s29 = int_to_ptr.vmem [resolvable:$true] %s590_s29 }
 0x4a7   : > { %s589_s17 = scalar_lea.hbm %s1236_s4, %s702_s21  ;;  %s578_s8 = scalar_lea.sflag [#allocation6], %s231_s28 }
 0x4a8   : > { %s592_s6 = sshll.u32 %s589_s17, 4  ;;  %s884_s22 = scalar_lea.hbm %s1236_s4, 64  ;;  %s593_s6 = int_to_ptr.hbm [resolvable:$true] %s592_s6 }
 0x4a9   : > { %s878_s12 = sshra.s32 %s593_s6, 4  ;;  %s879_s12 = int_to_ptr.hbm [resolvable:$true] %s878_s12 }
 0x4aa   : > { %s880_s13 = scalar_lea.hbm %s879_s12, 16  ;;  %p885_p13 = scmp.lt.s32.totalorder %s879_s12, %s1236_s4 }
 0x4ab   : > { %p881_p9 = scmp.ne.s32.totalorder %s879_s12, %s880_s13  ;;  %p886_p0 = scmp.lt.s32.totalorder %s884_s22, %s880_s13 }
 0x4ad   : > { %p882_p10 = pnand %p881_p9, %p1101_p12  ;;  %p887_p1 = por %p886_p0, %p885_p13 }
 0x4af   : > { %p883_p11 = pneg %p882_p10 }
 0x4b1   : > { %p888_p4 = pnand %p887_p1, %p883_p11 }
 0x4b3   : > { %891 = shalt.err (!%p888_p4)
}
 0x4b4   : > { %s992_s28 = smov 128   ;;  %s993_s20 = smov 8  }
 0x4b5   : > { %709 = dma.vmem_to_hbm [thread:$0]  (%p1101_p12), %s591_s29, 256, %s593_s6, %s578_s8, %s992_s28, %s992_s28, %s993_s20  }
 0x4b6 PF: > { %p720_p5 = scmp.ge.s32.totalorder %s986_s25, 2  ;;  %s607_s26 = sand.u32 1, %s946_s15  }
 0x4b7   : > { %s608_s5 = scalar_lea.sflag [#allocation6], %s607_s26 }
 0x4b8   : > { %p716_p6 = pnand %p720_p5, %p1114_p2 }
 0x4ba   : > { %p717_p8 = pneg %p716_p6 }
 0x4bc   : > { %941 = dma.done.wait (%p717_p8), %s608_s5, 256  }
 0x4bd   : > { %943 = vsyncadd (%p717_p8), %s608_s5, 4294967040  ;;  %s20_s25 = sadd.s32 1, %s986_s25   ;;  %s1254_s21 = sld [smem:[#allocation10_spill]] }
 0x4be   : > { %p17_p3 = scmp.ge.s32.totalorder %s20_s25, 10   ;;  %s1255_s17 = sld [smem:[#allocation14_spill]] }
 0x4bf   : > { %s1256_s11 = sld [smem:[#allocation11_spill]]  ;;  %s1260_s15 = smov %s950_s16 }
 0x4c0   : > { %s1257_s20 = sld [smem:[#allocation15_spill]]  ;;  %s1262_s18 = smov %s962_s19 }
 0x4c1   : > { %s1258_s9 = sld [smem:[#allocation12_spill]]  ;;  %s1265_s22 = smov %s982_s24 }
 0x4c2   : > { %s1259_s10 = sld [smem:[#allocation13_spill]] }
 0x4c3   : > { %s1261_s16 = smov %s1254_s21  ;;  %s1264_s21 = smov %s978_s23 }
 0x4c4   :  { %19 = sbr.rel (!%p17_p3) target bundleno = 9 (0x9), region = 89 }
 0x4c5   : > { %s1263_s19 = smov %s1256_s11 }
 0x4c7   : > { %s1266_s23 = smov %s1258_s9 }
 0x4c8   : > { %s1267_s24 = smov %s1259_s10 }
 0x4c9   :  { %614 = vsyncpa [#allocation5], 1 }
 0x4ca   :  { %616 = vsyncpa [#allocation5 + $0x1], 1 }
 0x4cb   :  { %617 = vsyncpa [#allocation6], 1 }
 0x4cc   :  { %619 = vsyncpa [#allocation6 + $0x1], 1 }

</bundles_post_ra>
